<compile_context>
chip_gen: v7x
topology: tpu7x:2x2x1
jax: 0.10.0
libtpu: 0.0.40
codegen_flags: <defaults>
</compile_context>

<pallas_src>
import jax
import jax.numpy as jnp
from jax import lax
from jax.experimental import pallas as pl
from jax.experimental.pallas import tpu as pltpu

BASE_THETA = 0.5
K_DOP = 0.2
K_NOR = 0.15
K_SERO = 0.1


def _kernel_attention_kernel(xq_ref, xkv_ref, wq_ref, wk_ref, wv_ref, wo_ref,
                             bias_ref, o_ref):
    # xq_ref:  (1, TQ, D) bf16   query rows for this grid step
    # xkv_ref: (1, S,  D) bf16   full sequence for k/v of this batch element
    # wX_ref:  (D, D)     bf16   pre-transposed (in, out) weights
    # bias_ref:(4, D)     f32    [bq, bk, bv, bo]
    xq = xq_ref[0]                      # (TQ, D) bf16
    xkv = xkv_ref[0]                    # (S, D)  bf16
    biases = bias_ref[...]              # (4, D)  f32

    q = jnp.dot(xq, wq_ref[...], preferred_element_type=jnp.float32) \
        + biases[0][None, :]                                     # (TQ, D) f32
    k = jnp.dot(xkv, wk_ref[...], preferred_element_type=jnp.float32) \
        + biases[1][None, :]                                     # (S, D)  f32
    v = jnp.dot(xkv, wv_ref[...], preferred_element_type=jnp.float32) \
        + biases[2][None, :]                                     # (S, D)  f32

    # qk = q @ k^T via dot_general (no materialized transpose), bf16 MXU inputs.
    qk = lax.dot_general(
        q.astype(jnp.bfloat16), k.astype(jnp.bfloat16),
        dimension_numbers=(((1,), (1,)), ((), ())),
        preferred_element_type=jnp.float32)                      # (TQ, S) f32

    # theta = base + k_dop*sigmoid(qk) + k_nor*tanh(qk) + k_sero*relu(qk)
    # sigmoid(z) = 0.5*(1 + tanh(z/2)); additive constants cancel in softmax,
    # so the logits below give exactly the same softmax as the original theta.
    logits = ((0.5 * K_DOP) * jnp.tanh(0.5 * qk)
              + K_NOR * jnp.tanh(qk)
              + K_SERO * jnp.maximum(qk, 0.0))

    # numerically stable softmax over the key axis
    m = jnp.max(logits, axis=-1, keepdims=True)
    p = jnp.exp(logits - m)
    denom = jnp.sum(p, axis=-1, keepdims=True)
    attn = p * pl.reciprocal(denom, approx=True)                 # (TQ, S) f32

    out = jnp.dot(attn.astype(jnp.bfloat16), v.astype(jnp.bfloat16),
                  preferred_element_type=jnp.float32)            # (TQ, D) f32
    y = jnp.dot(out.astype(jnp.bfloat16), wo_ref[...],
                preferred_element_type=jnp.float32) \
        + biases[3][None, :]                                     # (TQ, D) f32

    o_ref[0] = y.astype(o_ref.dtype)


def _choose_q_tile(seq_len):
    """Largest convenient q-tile: full S when small, else a divisor <= 256."""
    if seq_len <= 256:
        return seq_len
    for t in (256, 128, 64, 32, 16, 8):
        if seq_len % t == 0:
            return t
    return seq_len


def kernel_attention(x, params):
    """x: (B, S, D) float32; params: PyTorch-style (out,in) weights, (D,) biases."""
    B, S, D = x.shape
    out_dtype = x.dtype

    tq = _choose_q_tile(S)
    n_q = S // tq

    # Host-side prep: bf16 activations, pre-transposed bf16 weights, packed biases.
    x_bf = x.astype(jnp.bfloat16)
    wq_t = params["wq"].T.astype(jnp.bfloat16)
    wk_t = params["wk"].T.astype(jnp.bfloat16)
    wv_t = params["wv"].T.astype(jnp.bfloat16)
    wo_t = params["wo"].T.astype(jnp.bfloat16)
    biases = jnp.stack(
        [params["bq"], params["bk"], params["bv"], params["bo"]], axis=0
    ).astype(jnp.float32)                                        # (4, D)

    w_spec = pl.BlockSpec((D, D), lambda b, qi: (0, 0))          # grid-invariant
    b_spec = pl.BlockSpec((4, D), lambda b, qi: (0, 0))          # grid-invariant
    xq_spec = pl.BlockSpec((1, tq, D), lambda b, qi: (b, qi, 0))
    xkv_spec = pl.BlockSpec((1, S, D), lambda b, qi: (b, 0, 0))
    out_spec = pl.BlockSpec((1, tq, D), lambda b, qi: (b, qi, 0))

    flops = int(B * (8 * S * D * D + 4 * S * S * D))
    transcendentals = int(3 * B * S * S)
    bytes_accessed = int(2 * B * S * D * 2      # x read twice (bf16)
                         + 4 * D * D * 2        # bf16 weights
                         + 4 * D * 4            # biases
                         + B * S * D * 4)       # f32 output

    return pl.pallas_call(
        _kernel_attention_kernel,
        out_shape=jax.ShapeDtypeStruct((B, S, D), out_dtype),
        grid_spec=pltpu.PrefetchScalarGridSpec(
            num_scalar_prefetch=0,
            grid=(B, n_q),
            in_specs=[xq_spec, xkv_spec,
                      w_spec, w_spec, w_spec, w_spec,
                      b_spec],
            out_specs=out_spec,
        ),
        compiler_params=pltpu.CompilerParams(
            dimension_semantics=("parallel", "parallel"),
            vmem_limit_bytes=64 * 1024 * 1024,
        ),
        cost_estimate=pl.CostEstimate(
            flops=flops,
            transcendentals=transcendentals,
            bytes_accessed=bytes_accessed,
        ),
    )(x_bf, x_bf, wq_t, wk_t, wv_t, wo_t, biases)


def _reference(x, params):
    """Pure-JAX f32 reference using the original (sigmoid-form) theta."""
    def lin(t, w, b):
        return jnp.einsum("bsd,od->bso", t, w) + b
    q = lin(x, params["wq"], params["bq"])
    k = lin(x, params["wk"], params["bk"])
    v = lin(x, params["wv"], params["bv"])
    qk = jnp.einsum("bqd,bkd->bqk", q, k)
    theta = (BASE_THETA + K_DOP * jax.nn.sigmoid(qk)
             + K_NOR * jnp.tanh(qk) + K_SERO * jnp.maximum(qk, 0.0))
    attn = jax.nn.softmax(theta, axis=-1)
    out = jnp.einsum("bqk,bkd->bqd", attn, v)
    return lin(out, params["wo"], params["bo"])


def _init_params(key, dim):
    # Deterministic synthetic init (uniform like PyTorch Linear default bound).
    keys = jax.random.split(key, 8)
    bound = 1.0 / (dim ** 0.5)
    def u(k, shape):
        return jax.random.uniform(k, shape, jnp.float32, -bound, bound)
    return {
        "wq": u(keys[0], (dim, dim)), "bq": u(keys[1], (dim,)),
        "wk": u(keys[2], (dim, dim)), "bk": u(keys[3], (dim,)),
        "wv": u(keys[4], (dim, dim)), "bv": u(keys[5], (dim,)),
        "wo": u(keys[6], (dim, dim)), "bo": u(keys[7], (dim,)),
    }


if __name__ == "__main__":
    B, S, D = 2, 8, 32
    key = jax.random.PRNGKey(0)
    kx, kp = jax.random.split(key)
    x = jax.random.normal(kx, (B, S, D), jnp.float32)
    params = _init_params(kp, D)

    y = kernel_attention(x, params)
    y = jax.block_until_ready(y)

    y_ref = _reference(x, params)
    assert y.shape == (B, S, D)
    max_err = float(jnp.max(jnp.abs(y - y_ref)))
    # bf16 MXU inputs (f32 accumulate) -> slightly looser tolerance than pure f32.
    assert jnp.allclose(y, y_ref, atol=3e-2, rtol=3e-2), \
        f"mismatch vs reference (max abs err {max_err})"
    print("KERNEL_OK")
</pallas_src>

<mosaic_0001>
module attributes {stable_mosaic.version = 11 : i64} {
  func.func @_kernel_attention_kernel(%arg0: i32, %arg1: i32, %arg2: memref<1x8x32xbf16, #tpu.memory_space<vmem>>, %arg3: memref<1x8x32xbf16, #tpu.memory_space<vmem>>, %arg4: memref<32x32xbf16, #tpu.memory_space<vmem>>, %arg5: memref<32x32xbf16, #tpu.memory_space<vmem>>, %arg6: memref<32x32xbf16, #tpu.memory_space<vmem>>, %arg7: memref<32x32xbf16, #tpu.memory_space<vmem>>, %arg8: memref<4x32xf32, #tpu.memory_space<vmem>>, %arg9: memref<1x8x32xf32, #tpu.memory_space<vmem>>) attributes {dimension_semantics = [#tpu.dimension_semantics<parallel>, #tpu.dimension_semantics<parallel>], iteration_bounds = array<i64: 2, 1>, scalar_prefetch = 0 : i64, scratch_operands = 0 : i64, tpu.core_type = #tpu.core_type<tc>, window_params = [{transform_indices = @transform_0, window_bounds = array<i64: 1, 8, 32>}, {transform_indices = @transform_1, window_bounds = array<i64: 1, 8, 32>}, {pipeline_mode = #tpu.pipeline_mode<synchronous>, transform_indices = @transform_2, window_bounds = array<i64: 32, 32>}, {pipeline_mode = #tpu.pipeline_mode<synchronous>, transform_indices = @transform_3, window_bounds = array<i64: 32, 32>}, {pipeline_mode = #tpu.pipeline_mode<synchronous>, transform_indices = @transform_4, window_bounds = array<i64: 32, 32>}, {pipeline_mode = #tpu.pipeline_mode<synchronous>, transform_indices = @transform_5, window_bounds = array<i64: 32, 32>}, {pipeline_mode = #tpu.pipeline_mode<synchronous>, transform_indices = @transform_6, window_bounds = array<i64: 4, 32>}, {transform_indices = @transform_7, window_bounds = array<i64: 1, 8, 32>}]} {
    %c0 = arith.constant 0 : index
    %c0_0 = arith.constant 0 : index
    %c0_1 = arith.constant 0 : index
    %0 = vector.load %arg2[%c0, %c0_0, %c0_1] : memref<1x8x32xbf16, #tpu.memory_space<vmem>>, vector<1x8x32xbf16>
    %1 = vector.shape_cast %0 : vector<1x8x32xbf16> to vector<8x32xbf16>
    %c0_2 = arith.constant 0 : index
    %c0_3 = arith.constant 0 : index
    %c0_4 = arith.constant 0 : index
    %2 = vector.load %arg3[%c0_2, %c0_3, %c0_4] : memref<1x8x32xbf16, #tpu.memory_space<vmem>>, vector<1x8x32xbf16>
    %3 = vector.shape_cast %2 : vector<1x8x32xbf16> to vector<8x32xbf16>
    %c0_5 = arith.constant 0 : index
    %c0_6 = arith.constant 0 : index
    %4 = vector.load %arg8[%c0_5, %c0_6] : memref<4x32xf32, #tpu.memory_space<vmem>>, vector<4x32xf32>
    %c0_7 = arith.constant 0 : index
    %c0_8 = arith.constant 0 : index
    %5 = vector.load %arg4[%c0_7, %c0_8] : memref<32x32xbf16, #tpu.memory_space<vmem>>, vector<32x32xbf16>
    %cst = arith.constant dense<0.000000e+00> : vector<8x32xf32>
    %6 = tpu.matmul %1, %5, %cst {dimension_numbers = #tpu.dot_dimension_numbers<[1], [0], [0], [1], [0, 0, 1, 1], [], []>} : vector<8x32xbf16>, vector<32x32xbf16>, vector<8x32xf32> -> vector<8x32xf32>
    %7 = vector.extract_strided_slice %4 {offsets = [0, 0], sizes = [1, 32], strides = [1, 1]} : vector<4x32xf32> to vector<1x32xf32>
    %8 = vector.shape_cast %7 : vector<1x32xf32> to vector<32xf32>
    %9 = vector.shape_cast %8 : vector<32xf32> to vector<1x32xf32>
    %10 = vector.broadcast %9 : vector<1x32xf32> to vector<8x32xf32>
    %11 = arith.addf %6, %10 : vector<8x32xf32>
    %c0_9 = arith.constant 0 : index
    %c0_10 = arith.constant 0 : index
    %12 = vector.load %arg5[%c0_9, %c0_10] : memref<32x32xbf16, #tpu.memory_space<vmem>>, vector<32x32xbf16>
    %cst_11 = arith.constant dense<0.000000e+00> : vector<8x32xf32>
    %13 = tpu.matmul %3, %12, %cst_11 {dimension_numbers = #tpu.dot_dimension_numbers<[1], [0], [0], [1], [0, 0, 1, 1], [], []>} : vector<8x32xbf16>, vector<32x32xbf16>, vector<8x32xf32> -> vector<8x32xf32>
    %14 = vector.extract_strided_slice %4 {offsets = [1, 0], sizes = [1, 32], strides = [1, 1]} : vector<4x32xf32> to vector<1x32xf32>
    %15 = vector.shape_cast %14 : vector<1x32xf32> to vector<32xf32>
    %16 = vector.shape_cast %15 : vector<32xf32> to vector<1x32xf32>
    %17 = vector.broadcast %16 : vector<1x32xf32> to vector<8x32xf32>
    %18 = arith.addf %13, %17 : vector<8x32xf32>
    %c0_12 = arith.constant 0 : index
    %c0_13 = arith.constant 0 : index
    %19 = vector.load %arg6[%c0_12, %c0_13] : memref<32x32xbf16, #tpu.memory_space<vmem>>, vector<32x32xbf16>
    %cst_14 = arith.constant dense<0.000000e+00> : vector<8x32xf32>
    %20 = tpu.matmul %3, %19, %cst_14 {dimension_numbers = #tpu.dot_dimension_numbers<[1], [0], [0], [1], [0, 0, 1, 1], [], []>} : vector<8x32xbf16>, vector<32x32xbf16>, vector<8x32xf32> -> vector<8x32xf32>
    %21 = vector.extract_strided_slice %4 {offsets = [2, 0], sizes = [1, 32], strides = [1, 1]} : vector<4x32xf32> to vector<1x32xf32>
    %22 = vector.shape_cast %21 : vector<1x32xf32> to vector<32xf32>
    %23 = vector.shape_cast %22 : vector<32xf32> to vector<1x32xf32>
    %24 = vector.broadcast %23 : vector<1x32xf32> to vector<8x32xf32>
    %25 = arith.addf %20, %24 : vector<8x32xf32>
    %26 = arith.truncf %11 : vector<8x32xf32> to vector<8x32xbf16>
    %27 = arith.truncf %18 : vector<8x32xf32> to vector<8x32xbf16>
    %cst_15 = arith.constant dense<0.000000e+00> : vector<8x8xf32>
    %28 = tpu.matmul %26, %27, %cst_15 {dimension_numbers = #tpu.dot_dimension_numbers<[1], [1], [0], [0], [0, 0, 1, 0], [], []>} : vector<8x32xbf16>, vector<8x32xbf16>, vector<8x8xf32> -> vector<8x8xf32>
    %cst_16 = arith.constant 5.000000e-01 : f32
    %29 = vector.broadcast %cst_16 : f32 to vector<8x8xf32>
    %30 = arith.mulf %29, %28 : vector<8x8xf32>
    %31 = math.tanh %30 : vector<8x8xf32>
    %cst_17 = arith.constant 1.000000e-01 : f32
    %32 = vector.broadcast %cst_17 : f32 to vector<8x8xf32>
    %33 = arith.mulf %32, %31 : vector<8x8xf32>
    %34 = math.tanh %28 : vector<8x8xf32>
    %cst_18 = arith.constant 1.500000e-01 : f32
    %35 = vector.broadcast %cst_18 : f32 to vector<8x8xf32>
    %36 = arith.mulf %35, %34 : vector<8x8xf32>
    %37 = arith.addf %33, %36 : vector<8x8xf32>
    %cst_19 = arith.constant 0.000000e+00 : f32
    %38 = vector.broadcast %cst_19 : f32 to vector<8x8xf32>
    %39 = arith.maximumf %28, %38 : vector<8x8xf32>
    %cst_20 = arith.constant 1.000000e-01 : f32
    %40 = vector.broadcast %cst_20 : f32 to vector<8x8xf32>
    %41 = arith.mulf %40, %39 : vector<8x8xf32>
    %42 = arith.addf %37, %41 : vector<8x8xf32>
    %cst_21 = arith.constant dense<0xFF800000> : vector<8xf32>
    %43 = vector.multi_reduction <maximumf>, %42, %cst_21 [1] : vector<8x8xf32> to vector<8xf32>
    %44 = vector.shape_cast %43 : vector<8xf32> to vector<8x1xf32>
    %45 = vector.broadcast %44 : vector<8x1xf32> to vector<8x8xf32>
    %46 = arith.subf %42, %45 : vector<8x8xf32>
    %47 = math.exp %46 : vector<8x8xf32>
    %cst_22 = arith.constant dense<0.000000e+00> : vector<8xf32>
    %48 = vector.multi_reduction <add>, %47, %cst_22 [1] : vector<8x8xf32> to vector<8xf32>
    %49 = vector.shape_cast %48 : vector<8xf32> to vector<8x1xf32>
    %50 = tpu.reciprocal %49 {approx = true} : vector<8x1xf32> -> vector<8x1xf32>
    %51 = vector.broadcast %50 : vector<8x1xf32> to vector<8x8xf32>
    %52 = arith.mulf %47, %51 : vector<8x8xf32>
    %53 = arith.truncf %52 : vector<8x8xf32> to vector<8x8xbf16>
    %54 = arith.truncf %25 : vector<8x32xf32> to vector<8x32xbf16>
    %cst_23 = arith.constant dense<0.000000e+00> : vector<8x32xf32>
    %55 = tpu.matmul %53, %54, %cst_23 {dimension_numbers = #tpu.dot_dimension_numbers<[1], [0], [0], [1], [0, 0, 1, 1], [], []>} : vector<8x8xbf16>, vector<8x32xbf16>, vector<8x32xf32> -> vector<8x32xf32>
    %56 = arith.truncf %55 : vector<8x32xf32> to vector<8x32xbf16>
    %c0_24 = arith.constant 0 : index
    %c0_25 = arith.constant 0 : index
    %57 = vector.load %arg7[%c0_24, %c0_25] : memref<32x32xbf16, #tpu.memory_space<vmem>>, vector<32x32xbf16>
    %cst_26 = arith.constant dense<0.000000e+00> : vector<8x32xf32>
    %58 = tpu.matmul %56, %57, %cst_26 {dimension_numbers = #tpu.dot_dimension_numbers<[1], [0], [0], [1], [0, 0, 1, 1], [], []>} : vector<8x32xbf16>, vector<32x32xbf16>, vector<8x32xf32> -> vector<8x32xf32>
    %59 = vector.extract_strided_slice %4 {offsets = [3, 0], sizes = [1, 32], strides = [1, 1]} : vector<4x32xf32> to vector<1x32xf32>
    %60 = vector.shape_cast %59 : vector<1x32xf32> to vector<32xf32>
    %61 = vector.shape_cast %60 : vector<32xf32> to vector<1x32xf32>
    %62 = vector.broadcast %61 : vector<1x32xf32> to vector<8x32xf32>
    %63 = arith.addf %58, %62 : vector<8x32xf32>
    %c0_27 = arith.constant 0 : index
    %c0_28 = arith.constant 0 : index
    %c0_29 = arith.constant 0 : index
    %64 = vector.load %arg9[%c0_27, %c0_28, %c0_29] : memref<1x8x32xf32, #tpu.memory_space<vmem>>, vector<1x8x32xf32>
    %65 = vector.shape_cast %64 : vector<1x8x32xf32> to vector<8x32xf32>
    %66 = vector.shape_cast %63 : vector<8x32xf32> to vector<1x8x32xf32>
    tpu.vector_store %arg9[%c0_27, %c0_28, %c0_29], %66 {strides = array<i32>} : memref<1x8x32xf32, #tpu.memory_space<vmem>>, vector<1x8x32xf32>,
    return
  }
  func.func @transform_0(%arg0: i32, %arg1: i32) -> (i32, i32, i32) {
    %c0_i32 = arith.constant 0 : i32
    %c0_i32_0 = arith.constant 0 : i32
    return %arg0, %arg1, %c0_i32 : i32, i32, i32
  }
  func.func @transform_1(%arg0: i32, %arg1: i32) -> (i32, i32, i32) {
    %c0_i32 = arith.constant 0 : i32
    %c0_i32_0 = arith.constant 0 : i32
    %c0_i32_1 = arith.constant 0 : i32
    return %arg0, %c0_i32, %c0_i32_0 : i32, i32, i32
  }
  func.func @transform_2(%arg0: i32, %arg1: i32) -> (i32, i32) {
    %c0_i32 = arith.constant 0 : i32
    %c0_i32_0 = arith.constant 0 : i32
    %c0_i32_1 = arith.constant 0 : i32
    return %c0_i32, %c0_i32_0 : i32, i32
  }
  func.func @transform_3(%arg0: i32, %arg1: i32) -> (i32, i32) {
    %c0_i32 = arith.constant 0 : i32
    %c0_i32_0 = arith.constant 0 : i32
    %c0_i32_1 = arith.constant 0 : i32
    return %c0_i32, %c0_i32_0 : i32, i32
  }
  func.func @transform_4(%arg0: i32, %arg1: i32) -> (i32, i32) {
    %c0_i32 = arith.constant 0 : i32
    %c0_i32_0 = arith.constant 0 : i32
    %c0_i32_1 = arith.constant 0 : i32
    return %c0_i32, %c0_i32_0 : i32, i32
  }
  func.func @transform_5(%arg0: i32, %arg1: i32) -> (i32, i32) {
    %c0_i32 = arith.constant 0 : i32
    %c0_i32_0 = arith.constant 0 : i32
    %c0_i32_1 = arith.constant 0 : i32
    return %c0_i32, %c0_i32_0 : i32, i32
  }
  func.func @transform_6(%arg0: i32, %arg1: i32) -> (i32, i32) {
    %c0_i32 = arith.constant 0 : i32
    %c0_i32_0 = arith.constant 0 : i32
    %c0_i32_1 = arith.constant 0 : i32
    return %c0_i32, %c0_i32_0 : i32, i32
  }
  func.func @transform_7(%arg0: i32, %arg1: i32) -> (i32, i32, i32) {
    %c0_i32 = arith.constant 0 : i32
    %c0_i32_0 = arith.constant 0 : i32
    return %arg0, %arg1, %c0_i32 : i32, i32, i32
  }
}

</mosaic_0001>

<bundles_post_ra>
// kernel: tpu_custom_call.1
= control target key start
LH: loop header
LB: loop body
LE: loop exit
PB: predicated region body
PF: predicated region fallthrough
CT: control target
= control target key end

     0   :  { %s1956_s0 = inlined_call_operand.hbm [shape: bf16[2,8,32], index: 0, kind: input, shape index: {}]   ;;  %s1957_s1 = inlined_call_operand.hbm [shape: bf16[2,8,32], index: 1, kind: input, shape index: {}]   ;;  %s1958_s2 = inlined_call_operand.hbm [shape: bf16[32,32], index: 2, kind: input, shape index: {}]   ;;  %s1959_s3 = inlined_call_operand.hbm [shape: bf16[32,32], index: 3, kind: input, shape index: {}]   ;;  %s1960_s4 = inlined_call_operand.hbm [shape: bf16[32,32], index: 4, kind: input, shape index: {}]   ;;  %s1961_s5 = inlined_call_operand.hbm [shape: bf16[32,32], index: 5, kind: input, shape index: {}]   ;;  %s1962_s6 = inlined_call_operand.hbm [shape: f32[4,32], index: 6, kind: input, shape index: {}]   ;;  %s1963_s7 = inlined_call_operand.hbm [shape: f32[2,8,32], index: 7, kind: output, shape index: {}]  }
   0x1   :  { %1969 = sst [smem:[#allocation21_spill]] %s1958_s2 }
   0x2   :  { %1970 = sst [smem:[#allocation22_spill]] %s1959_s3 }
   0x3   :  { %1971 = sst [smem:[#allocation23_spill]] %s1960_s4 }
   0x4   :  { %1972 = sst [smem:[#allocation24_spill]] %s1961_s5 }
   0x5   :  { %1973 = sst [smem:[#allocation25_spill]] %s1962_s6 }
   0x6   :  { %1974 = sst [smem:[#allocation26_spill]] %s1963_s7 }
   0x7   :  { %12 = vsyncpa [#allocation3], 0 }
   0x8   :  { %14 = vsyncpa [#allocation3 + $0x1], 0 }
   0x9   :  { %15 = vsyncpa [#allocation6], 0 }
   0xa   :  { %17 = vsyncpa [#allocation6 + $0x1], 0 }
   0xb   :  { %18 = vsyncpa [#allocation9], 0 }
   0xc   :  { %19 = vsyncpa [#allocation12], 0 }
   0xd   :  { %20 = vsyncpa [#allocation4], 0 }
   0xe   :  { %22 = vsyncpa [#allocation4 + $0x1], 0  ;;  %s1547_s24 = smov 0   ;;  %s1549_s25 = smov 0  }
   0xf   :  { %s1551_s26 = smov 0   ;;  %s1553_s27 = smov 0  }
  0x10   :  { %s1555_s28 = smov 0   ;;  %s1557_s29 = smov 0  }
  0x11 LB: > { %s1578_s30 = sadd.s32 4294967295, %s1493_s29   ;;  %p959_p0 = scmp.ge.s32.totalorder %s1493_s29, 1  ;;  %s1493_s29 = sphi %s1557_s29, %s28_s29   ;;  %s1489_s28 = sphi %s1555_s28, %s2005_s28   ;;  %s1485_s27 = sphi %s1553_s27, %s2004_s27   ;;  %s1481_s26 = sphi %s1551_s26, %s2003_s26   ;;  %s1477_s25 = sphi %s1549_s25, %s2002_s25   ;;  %s1473_s24 = sphi %s1547_s24, %s2001_s24  }
  0x12   : > { %p1965_p1 = scmp.eq.s32.totalorder %s1578_s30, 0  ;;  %p232_p2 = scmp.lt.s32.totalorder %s1493_s29, 3 }
  0x13   : > { %s1495_s9 = smov [#allocation7]   ;;  %s1496_s12 = smov [#allocation8]  }
  0x14   : > { %p1583_p3 = pnand %p959_p0, %p232_p2  ;;  %s244_s10 = sshll.u32 %s1495_s9, 4  ;;  %s1587_s10 = int_to_ptr.vmem [resolvable:$true] %s244_s10 }
  0x15   : > { %s257_s13 = sshll.u32 %s1496_s12, 4  ;;  %s1497_s14 = smov [#allocation11]   ;;  %s1598_s13 = int_to_ptr.vmem [resolvable:$true] %s257_s13 }
  0x16   : > { %s1975_s8 = scalar_select %p1583_p3, 1, 0 }
  0x17   : > { %p1083_p4 = pneg %p1583_p3  ;;  %s1600_s15 = sshll.u32 %s1497_s14, 4  ;;  %s284_s15 = int_to_ptr.vmem [resolvable:$true] %s1600_s15 }
  0x18   : > { %s1977_s2 = sld [smem:[#allocation21_spill]] }
  0x19   : > { %p1594_p6 = pnand %p1083_p4, %p1965_p1 }
  0x1b   : > { %p1610_p8 = pneg %p1594_p6 }
  0x1e   : > { %s1195_s18 = scalar_lea.hbm %s1977_s2, 256 }
  0x1f   : > { %p1196_p7 = scmp.ne.s32.totalorder %s1977_s2, %s1195_s18  ;;  %p1202_p11 = scmp.lt.u32.totalorder %s1195_s18, %s1977_s2 }
  0x21   : > { %p1198_p9 = pnand %p1610_p8, %p1196_p7 }
  0x23   : > { %p1199_p10 = pneg %p1198_p9 }
  0x25   : > { %p1204_p12 = pnand %p1202_p11, %p1199_p10 }
  0x27   : > { %1207 = shalt.err (!%p1204_p12)
}
  0x28   : > { %s1208_s9 = scalar_lea.vmem %s1587_s10, 256  ;;  %p1216_p4 = scmp.lt.s32.totalorder %s1587_s10, %s1587_s10 }
  0x29   : > { %p1209_p13 = scmp.ne.s32.totalorder %s1587_s10, %s1208_s9  ;;  %p1217_p5 = scmp.lt.s32.totalorder %s1208_s9, %s1208_s9 }
  0x2b   : > { %p1211_p0 = pnand %p1209_p13, %p1610_p8  ;;  %p1218_p7 = por %p1217_p5, %p1216_p4 }
  0x2d   : > { %p1212_p2 = pneg %p1211_p0 }
  0x2f   : > { %p1219_p9 = pnand %p1218_p7, %p1212_p2 }
  0x31   : > { %1222 = shalt.err (!%p1219_p9)
}
  0x32   : > { %s1498_s12 = smov 64   ;;  %s1499_s14 = smov 4  }
  0x33   : > { %1086 = dma.hbm_to_vmem [thread:$0]  (!%p1594_p6), %s1977_s2, 256, %s1587_s10, [#allocation6], %s1498_s12, %s1498_s12, %s1499_s14  }
  0x34   : > { %s1979_s3 = sld [smem:[#allocation22_spill]] }
  0x3a   : > { %s1223_s20 = scalar_lea.hbm %s1979_s3, 256 }
  0x3b   : > { %p1224_p5 = scmp.ne.s32.totalorder %s1979_s3, %s1223_s20  ;;  %p1230_p12 = scmp.lt.u32.totalorder %s1223_s20, %s1979_s3 }
  0x3d   : > { %p1226_p10 = pnand %p1224_p5, %p1610_p8 }
  0x3f   : > { %p1227_p11 = pneg %p1226_p10 }
  0x41   : > { %p1232_p13 = pnand %p1230_p12, %p1227_p11 }
  0x43   : > { %1235 = shalt.err (!%p1232_p13)
}
  0x44   : > { %s1236_s10 = scalar_lea.vmem %s1598_s13, 256  ;;  %p1244_p7 = scmp.lt.s32.totalorder %s1598_s13, %s1598_s13 }
  0x45   : > { %p1237_p0 = scmp.ne.s32.totalorder %s1598_s13, %s1236_s10  ;;  %p1245_p9 = scmp.lt.s32.totalorder %s1236_s10, %s1236_s10 }
  0x47   : > { %p1239_p2 = pnand %p1237_p0, %p1610_p8  ;;  %p1246_p5 = por %p1245_p9, %p1244_p7 }
  0x49   : > { %p1240_p4 = pneg %p1239_p2 }
  0x4b   : > { %p1247_p10 = pnand %p1246_p5, %p1240_p4 }
  0x4d   : > { %1250 = shalt.err (!%p1247_p10)
}
  0x4e   : > { %1089 = dma.hbm_to_vmem [thread:$0]  (!%p1594_p6), %s1979_s3, 256, %s1598_s13, [#allocation9], %s1498_s12, %s1498_s12, %s1499_s14  }
  0x4f   : > { %s1980_s5 = sld [smem:[#allocation24_spill]] }
  0x55   : > { %s1251_s19 = scalar_lea.hbm %s1980_s5, 256 }
  0x56   : > { %p1252_p11 = scmp.ne.s32.totalorder %s1980_s5, %s1251_s19  ;;  %p1258_p0 = scmp.lt.u32.totalorder %s1251_s19, %s1980_s5 }
  0x58   : > { %p1254_p12 = pnand %p1252_p11, %p1610_p8 }
  0x5a   : > { %p1255_p13 = pneg %p1254_p12 }
  0x5c   : > { %p1260_p2 = pnand %p1258_p0, %p1255_p13 }
  0x5e   : > { %1263 = shalt.err (!%p1260_p2)
}
  0x5f   : > { %s1264_s10 = scalar_lea.vmem %s284_s15, 256  ;;  %p1272_p5 = scmp.lt.s32.totalorder %s284_s15, %s284_s15 }
  0x60   : > { %p1265_p4 = scmp.ne.s32.totalorder %s284_s15, %s1264_s10  ;;  %p1273_p10 = scmp.lt.s32.totalorder %s1264_s10, %s1264_s10 }
  0x62   : > { %p1267_p7 = pnand %p1265_p4, %p1610_p8  ;;  %p1274_p1 = por %p1273_p10, %p1272_p5 }
  0x64   : > { %p1268_p9 = pneg %p1267_p7 }
  0x66   : > { %p1275_p3 = pnand %p1274_p1, %p1268_p9 }
  0x68   : > { %1278 = shalt.err (!%p1275_p3)
}
  0x69   : > { %1095 = dma.hbm_to_vmem [thread:$0]  (!%p1594_p6), %s1980_s5, 256, %s284_s15, [#allocation12], %s1498_s12, %s1498_s12, %s1499_s14  }
  0x6a   : > { %s1500_s16 = smov [#allocation10]   ;;  %s1501_s18 = smov [#allocation13]  }
  0x6b   : > { %s270_s17 = sshll.u32 %s1500_s16, 4  ;;  %s297_s19 = sshll.u32 %s1501_s18, 4  ;;  %s271_s17 = int_to_ptr.vmem [resolvable:$true] %s270_s17  ;;  %s298_s19 = int_to_ptr.vmem [resolvable:$true] %s297_s19 }
  0x6c   : > { %s1981_s4 = sld [smem:[#allocation23_spill]] }
  0x72   : > { %s1279_s23 = scalar_lea.hbm %s1981_s4, 256 }
  0x73   : > { %p1280_p1 = scmp.ne.s32.totalorder %s1981_s4, %s1279_s23  ;;  %p1286_p12 = scmp.lt.u32.totalorder %s1279_s23, %s1981_s4 }
  0x75   : > { %p1282_p3 = pnand %p1280_p1, %p1610_p8 }
  0x77   : > { %p1283_p11 = pneg %p1282_p3 }
  0x79   : > { %p1288_p13 = pnand %p1286_p12, %p1283_p11 }
  0x7b   : > { %1291 = shalt.err (!%p1288_p13)
}
  0x7c   : > { %s1292_s15 = scalar_lea.vmem %s271_s17, 256  ;;  %p1300_p7 = scmp.lt.s32.totalorder %s271_s17, %s271_s17 }
  0x7d   : > { %p1293_p0 = scmp.ne.s32.totalorder %s271_s17, %s1292_s15  ;;  %p1301_p9 = scmp.lt.s32.totalorder %s1292_s15, %s1292_s15 }
  0x7f   : > { %p1295_p2 = pnand %p1293_p0, %p1610_p8  ;;  %p1302_p5 = por %p1301_p9, %p1300_p7 }
  0x81   : > { %p1296_p4 = pneg %p1295_p2 }
  0x83   : > { %p1303_p10 = pnand %p1302_p5, %p1296_p4 }
  0x85   : > { %1306 = shalt.err (!%p1303_p10)
}
  0x86   : > { %1092 = dma.hbm_to_vmem [thread:$0]  (!%p1594_p6), %s1981_s4, 256, %s271_s17, [#allocation9], %s1498_s12, %s1498_s12, %s1499_s14  }
  0x87   : > { %s1982_s6 = sld [smem:[#allocation25_spill]] }
  0x8d   : > { %s1307_s20 = scalar_lea.hbm %s1982_s6, 64 }
  0x8e   : > { %p1308_p1 = scmp.ne.s32.totalorder %s1982_s6, %s1307_s20  ;;  %p1314_p12 = scmp.lt.u32.totalorder %s1307_s20, %s1982_s6 }
  0x90   : > { %p1310_p3 = pnand %p1308_p1, %p1610_p8 }
  0x92   : > { %p1311_p11 = pneg %p1310_p3 }
  0x94   : > { %p1316_p13 = pnand %p1314_p12, %p1311_p11 }
  0x96   : > { %1319 = shalt.err (!%p1316_p13)
}
  0x97   : > { %s1320_s13 = scalar_lea.vmem %s298_s19, 64  ;;  %p1328_p7 = scmp.lt.s32.totalorder %s298_s19, %s298_s19 }
  0x98   : > { %p1321_p0 = scmp.ne.s32.totalorder %s298_s19, %s1320_s13  ;;  %p1329_p9 = scmp.lt.s32.totalorder %s1320_s13, %s1320_s13 }
  0x9a   : > { %p1323_p2 = pnand %p1321_p0, %p1610_p8  ;;  %p1330_p5 = por %p1329_p9, %p1328_p7 }
  0x9c   : > { %p1324_p4 = pneg %p1323_p2 }
  0x9e   : > { %p1331_p10 = pnand %p1330_p5, %p1324_p4 }
  0xa0   : > { %1334 = shalt.err (!%p1331_p10)
}
  0xa1   : > { %1098 = dma.hbm_to_vmem [thread:$0]  (!%p1594_p6), %s1982_s6, 64, %s298_s19, [#allocation12]  }
  0xa2   : > { %s958_s21 = sadd.s32 4294967294, %s1493_s29   ;;  %s40_s17 = sadd.s32 1, %s1489_s28 }
  0xa3   : > { %s49_s11 = sadd.s32 1, %s1481_s26  ;;  %p42_p8 = scmp.ge.s32.totalorder %s40_s17, 2 }
  0xa4   : > { %p56_p1 = scmp.ne.s32.totalorder %s1481_s26, %s1477_s25  ;;  %p57_p3 = scmp.eq.s32.totalorder %s1493_s29, 0 }
  0xa5   : > { %p62_p11 = scmp.ne.s32.totalorder %s1477_s25, %s1473_s24  ;;  %s2007_s17 = smov (%p42_p8, %s40_s17), 0 }
  0xa6   : > { %p1731_p12 = por %p57_p3, %p56_p1  ;;  %p1984_p13 = scmp.eq.s32.totalorder %s1578_s30, 0 }
  0xa7   : > { %s44_s2 = ssub.s32 %s1489_s28, %s2007_s17  ;;  %p219_p0 = scmp.eq.s32.totalorder %s1578_s30, 1 }
  0xa8   : > { %p1737_p6 = por %p1984_p13, %p62_p11  ;;  %p47_p2 = scmp.eq.s32.totalorder %s44_s2, 0 }
  0xa9   : > { %p225_p4 = scmp.eq.s32.totalorder %s958_s21, 1  ;;  %p1744_p7 = por %p219_p0, %p56_p1 }
  0xaa   : > { %s1985_s19 = scalar_select %p1737_p6, 1, 0 }
  0xab   : > { %s1986_s7 = scalar_select %p1744_p7, 1, 0 }
  0xac   : > { %p1115_p9 = scmp.lt.s32.totalorder %s1493_s29, 2  ;;  %p1752_p5 = por %p225_p4, %p62_p11 }
  0xad   : > { %s1750_s16 = scalar_select %p47_p2, %s1481_s26, %s49_s11  }
  0xae   : > { %s1987_s18 = scalar_select %p1752_p5, 1, 0 }
  0xaf   : > { %s308_s20 = sand.u32 1, %s1481_s26   ;;  %s967_s23 = sshll.u32 %s1489_s28, 6 }
  0xb0   : > { %s1757_s22 = sshll.u32 %s308_s20, 2  ;;  %s1763_s13 = scalar_lea.hbm %s1956_s0, %s967_s23 }
  0xb1   : > { %s312_s12 = scalar_lea.vmem [#allocation2], %s1757_s22  ;;  %p1770_p10 = pnand %p1115_p9, %p1731_p12 }
  0xb2   : > { %s320_s14 = sshll.u32 %s312_s12, 4  ;;  %s1777_s9 = scalar_lea.hbm %s1957_s1, %s967_s23  ;;  %s1766_s14 = int_to_ptr.vmem [resolvable:$true] %s320_s14 }
  0xb3   : > { %s327_s10 = sand.u32 1, %s1493_s29   ;;  %s309_s3 = scalar_lea.sflag [#allocation3], %s308_s20 }
  0xb4   : > { %s1335_s4 = scalar_lea.hbm %s1763_s13, 64  ;;  %p1337_p1 = pneg %p1770_p10 }
  0xb5   : > { %p1336_p8 = scmp.ne.s32.totalorder %s1763_s13, %s1335_s4  ;;  %s1340_s5 = scalar_lea.hbm %s1956_s0, 128 }
  0xb6   : > { %p1341_p12 = scmp.lt.u32.totalorder %s1763_s13, %s1956_s0  ;;  %p1342_p13 = scmp.lt.u32.totalorder %s1340_s5, %s1335_s4 }
  0xb7   : > { %p1338_p3 = pnand %p1337_p1, %p1336_p8  ;;  %p1344_p2 = scmp.lt.u32.totalorder %s1335_s4, %s1763_s13 }
  0xb8   : > { %p1343_p0 = por %p1342_p13, %p1341_p12 }
  0xb9   : > { %p1339_p11 = pneg %p1338_p3 }
  0xba   : > { %p1345_p4 = por %p1344_p2, %p1343_p0 }
  0xbc   : > { %p1346_p9 = pnand %p1345_p4, %p1339_p11 }
  0xbe   : > { %1349 = shalt.err (!%p1346_p9)
}
  0xbf   : > { %s1350_s20 = scalar_lea.vmem %s1766_s14, 64  ;;  %s1502_s23 = smov [#allocation2]  }
  0xc0   : > { %p1351_p8 = scmp.ne.s32.totalorder %s1766_s14, %s1350_s20  ;;  %s1355_s2 = sshll.u32 %s1502_s23, 4  ;;  %s1356_s2 = int_to_ptr.vmem [resolvable:$false] %s1355_s2 }
  0xc1   : > { %s1357_s6 = scalar_lea.vmem %s1356_s2, 128  ;;  %p1358_p7 = scmp.lt.s32.totalorder %s1766_s14, %s1356_s2 }
  0xc2   : > { %p1353_p3 = pnand %p1351_p8, %p1337_p1  ;;  %p1359_p12 = scmp.lt.s32.totalorder %s1357_s6, %s1350_s20 }
  0xc4   : > { %p1354_p5 = pneg %p1353_p3  ;;  %p1360_p13 = por %p1359_p12, %p1358_p7 }
  0xc6   : > { %p1361_p0 = pnand %p1360_p13, %p1354_p5 }
  0xc8   : > { %1364 = shalt.err (!%p1361_p0)
}
  0xc9   : > { %1102 = dma.hbm_to_vmem [thread:$0]  (!%p1770_p10), %s1763_s13, 64, %s1766_s14, %s309_s3  }
  0xca   : > { %s331_s4 = scalar_lea.vmem [#allocation5], %s1757_s22  ;;  %s328_s15 = scalar_lea.sflag [#allocation6], %s327_s10 }
  0xcb   : > { %s338_s5 = sshll.u32 %s331_s4, 4  ;;  %s1365_s12 = scalar_lea.hbm %s1777_s9, 64  ;;  %s339_s5 = int_to_ptr.vmem [resolvable:$true] %s338_s5 }
  0xcc   : > { %p1366_p7 = scmp.ne.s32.totalorder %s1777_s9, %s1365_s12  ;;  %s1370_s23 = scalar_lea.hbm %s1957_s1, 128 }
  0xcd   : > { %p1371_p2 = scmp.lt.u32.totalorder %s1777_s9, %s1957_s1  ;;  %p1372_p4 = scmp.lt.u32.totalorder %s1370_s23, %s1365_s12 }
  0xce   : > { %p1368_p5 = pnand %p1366_p7, %p1337_p1  ;;  %p1374_p8 = scmp.lt.u32.totalorder %s1365_s12, %s1777_s9 }
  0xcf   : > { %p1373_p9 = por %p1372_p4, %p1371_p2 }
  0xd0   : > { %p1369_p11 = pneg %p1368_p5 }
  0xd1   : > { %p1375_p3 = por %p1374_p8, %p1373_p9 }
  0xd3   : > { %p1376_p12 = pnand %p1375_p3, %p1369_p11 }
  0xd5   : > { %1379 = shalt.err (!%p1376_p12)
}
  0xd6   : > { %s1380_s3 = scalar_lea.vmem %s339_s5, 64  ;;  %s1503_s22 = smov [#allocation5]  }
  0xd7   : > { %p1381_p13 = scmp.ne.s32.totalorder %s339_s5, %s1380_s3  ;;  %s1385_s13 = sshll.u32 %s1503_s22, 4  ;;  %s1386_s13 = int_to_ptr.vmem [resolvable:$false] %s1385_s13 }
  0xd8   : > { %s1387_s14 = scalar_lea.vmem %s1386_s13, 128  ;;  %p1388_p5 = scmp.lt.s32.totalorder %s339_s5, %s1386_s13 }
  0xd9   : > { %p1383_p0 = pnand %p1381_p13, %p1337_p1  ;;  %p1389_p6 = scmp.lt.s32.totalorder %s1387_s14, %s1380_s3 }
  0xdb   : > { %p1384_p7 = pneg %p1383_p0  ;;  %p1390_p2 = por %p1389_p6, %p1388_p5 }
  0xdd   : > { %p1391_p4 = pnand %p1390_p2, %p1384_p7 }
  0xdf   : > { %1394 = shalt.err (!%p1391_p4)
}
  0xe0   : > { %1105 = dma.hbm_to_vmem [thread:$0]  (!%p1770_p10), %s1777_s9, 64, %s339_s5, %s328_s15  }
  0xe1   : > { %p1989_p11 = scmp.ne.s32.totalorder %s1975_s8, 0 }
  0xe2   : > { %s1830_s10 = sand.u32 (!%p1989_p11), 1, %s1477_s25   ;;  %p1990_p6 = scmp.ne.s32.totalorder (!%p1989_p11), %s1985_s19, 0 }
  0xe3   : > { %347 = sbr.rel (%p1989_p11) target bundleno = 1471 (0x5bf), region = 48  ;;  %s971_s4 = sshll.u32 (!%p1989_p11), %s1830_s10, 2 }
  0xe4   : > { %s350_s12 = scalar_lea.sflag (!%p1989_p11), [#allocation3], %s1830_s10  ;;  %s1834_s11 = scalar_lea.vmem (!%p1989_p11), [#allocation2], %s971_s4 }
  0xea   : > { %1448 = dma.done.wait (%p1990_p6), %s350_s12, 64  }
  0xeb   : > { %1450 = vsyncadd (%p1990_p6), %s350_s12, 4294967232  ;;  %s358_s21 = sand.u32 1, %s1578_s30   ;;  %s362_s9 = scalar_lea.vmem [#allocation5], %s971_s4 }
  0xec   : > { %s359_s8 = scalar_lea.sflag [#allocation6], %s358_s21 }
  0xed   : > { %1452 = dma.done.wait (%p1990_p6), %s359_s8, 64  }
  0xee   : > { %1454 = vsyncadd (%p1990_p6), %s359_s8, 4294967232  ;;  %p1991_p10 = scmp.eq.s32.totalorder %s1578_s30, 0 }
  0xf0   : > { %1456 = dma.done.wait (%p1991_p10), [#allocation6], 256   ;;  %p1992_p1 = pmov %p1991_p10 }
  0xf2   : > { %1458 = vsyncadd (%p1992_p1), [#allocation6], 4294967040  ;;  %p1993_p9 = pmov %p1992_p1 }
  0xf3   : > { %p1994_p8 = pmov %p1992_p1 }
  0xf4   : > { %1460 = dma.done.wait (%p1993_p9), [#allocation9], 512  }
  0xf5   : > { %1462 = vsyncadd (%p1994_p8), [#allocation9], 4294966784  ;;  %p1995_p3 = pmov %p1992_p1 }
  0xf6   : > { %p1996_p12 = pmov %p1992_p1 }
  0xf7   : > { %1464 = dma.done.wait (%p1995_p3), [#allocation12], 320  }
  0xf8   : > { %1466 = vsyncadd (%p1996_p12), [#allocation12], 4294966976  ;;  %v1504_v0 = vmov 0.0   ;;  %vm1505_vm0 = vmmov 0   ;;  %v1179_v1 = vld [vmem:[#allocation8] sm:$0xff]   ;;  %v1180_v2 = vld [vmem:[#allocation8 + $0x8] sm:$0xff]   ;;  %v426_v7 = vlaneseq }
  0xf9   : > { %1021 = vmatprep.subr.bf16.mxu1 %v1504_v0  ;;  %1013 = vmatprep.subr.bf16.mxu0 %v1504_v0  ;;  %v1181_v3 = vld [vmem:[#allocation7] sm:$0xff]   ;;  %v420_v4 = vld [vmem:[%s362_s9] sm:$0xf]  ;;  %vm442_vm1 = vcmask 261120   ;;  %v1182_v5 = vld [vmem:[#allocation7 + $0x8] sm:$0xff]   ;;  %vm666_vm2 = vcmask 64512  }
  0xfa   : > { %1025 = vmatprep.mubr.msk.bf16.mxu1 %vm1505_vm0, %v1504_v0  ;;  %1017 = vmatprep.mubr.msk.bf16.mxu0 %vm1505_vm0, %v1504_v0  ;;  %v419_v6 = vld [vmem:[%s1834_s11] sm:$0xf]  ;;  %v1874_v8 = vshrl.u32 %v426_v7, 7  ;;  %v1877_v10 = vld [vmem:[#allocation13] sm:$0xf]  ;;  %v1184_v28 = vld [vmem:[#allocation10 + $0x8] sm:$0xff]  }
  0xfb   : > { %1022 = vmatpush3.bf16.msra.mxu1 %v1179_v1  ;;  %1014 = vmatpush3.bf16.msra.mxu0 %v1181_v3  ;;  %v1183_v27 = vld [vmem:[#allocation10] sm:$0xff]   ;;  %vm683_vm3 = vcmask 1043456   ;;  %v1185_v57 = vld [vmem:[#allocation11] sm:$0xff]   ;;  %v1186_v62 = vld [vmem:[#allocation11 + $0x8] sm:$0xff]   ;;  %s978_s30 = sshll.u32 %s1830_s10, 3  ;;  %s994_s19 = sshll.u32 %s1485_s27, 7 }
  0xfc   : > { %1023 = vmatprep.subr.bf16.mxu1 %v1504_v0  ;;  %1015 = vmatprep.subr.bf16.mxu0 %v1504_v0  ;;  %v492_v9 = vsub.s32 1, %v1874_v8  ;;  %v428_v12 = vsub.s32 0, %v1874_v8  ;;  %v555_v48 = vsub.s32 2, %v1874_v8  ;;  %s417_s5 = scalar_lea.vmem [#allocation14], %s978_s30  ;;  %s1997_s2 = sld [smem:[#allocation26_spill]] }
  0xfd   : > { %s807_s15 = sshll.u32 %s417_s5, 4  ;;  %s793_s27 = scalar_lea.sflag [#allocation4], %s1830_s10  ;;  %s1908_s15 = int_to_ptr.vmem [resolvable:$true] %s807_s15 }
  0xfe   : > { %v493_v11 = vrot.slane %v1877_v10, %v492_v9  ;;  %v429_v16 = vrot.slane %v1877_v10, %v428_v12  ;;  %v556_v51 = vrot.slane %v1877_v10, %v555_v48  ;;  %s1395_s3 = scalar_lea.vmem %s1908_s15, 128  ;;  %p1998_p0 = scmp.ne.s32.totalorder %s1986_s7, 0 }
  0xff   : > { %1024 = vmatpush3.bf16.msra.mxu1 %v1180_v2  ;;  %1016 = vmatpush3.bf16.msra.mxu0 %v1182_v5  ;;  %p1396_p13 = scmp.ne.s32.totalorder %s1908_s15, %s1395_s3  ;;  %s1506_s22 = smov [#allocation14]  }
 0x100   : > { %1037 = vmatprep.subr.bf16.mxu1 %v1504_v0  ;;  %1029 = vmatprep.subr.bf16.mxu0 %v1504_v0  ;;  %s1399_s13 = sshll.u32 %s1506_s22, 4  ;;  %s1400_s13 = int_to_ptr.vmem [resolvable:$false] %s1399_s13 }
 0x101   : > { %p1397_p7 = pnand %p1396_p13, %p1998_p0  ;;  %s1401_s14 = scalar_lea.vmem %s1400_s13, 256 }
 0x102   : > { %1026 = vmatmul.mubr.msk.bf16.vlgmr.msra.gmra.mrb[0].mxu1 %vm442_vm1, %v420_v4  ;;  %1018 = vmatmul.mubr.msk.bf16.vlgmr.msra.gmra.mrb[0].mxu0 %vm442_vm1, %v419_v6  ;;  %s1906_s6 = scalar_lea.hbm %s1997_s2, %s994_s19  ;;  %p1402_p2 = scmp.lt.s32.totalorder %s1908_s15, %s1400_s13 }
 0x103   : > { %1039 = vmatprep.mubr.msk.bf16.mxu1 %vm1505_vm0, %v1504_v0  ;;  %1033 = vmatprep.mubr.msk.bf16.mxu0 %vm1505_vm0, %v1504_v0  ;;  %p1398_p5 = pneg %p1397_p7  ;;  %p1403_p4 = scmp.lt.s32.totalorder %s1401_s14, %s1395_s3 }
 0x104   : > { %1030 = vmatpush3.bf16.msra.mxu0 %v1183_v27 }
 0x105   : > { %1031 = vmatprep.subr.bf16.mxu0 %v1504_v0  ;;  %p1404_p11 = por %p1403_p4, %p1402_p2 }
 0x107   : > { %p1405_p6 = pnand %p1404_p11, %p1398_p5 }
 0x108   : > { %1032 = vmatpush3.bf16.msra.mxu0 %v1184_v28 }
 0x109   : > { %1043 = vmatprep.subr.bf16.mxu0 %v1504_v0 }
 0x10b   : > { %1034 = vmatmul.mubr.msk.bf16.vlgmr.msra.gmra.mrb[4].mxu0 %vm442_vm1, %v420_v4 }
 0x10c   : > { %1045 = vmatprep.mubr.msk.bf16.mxu0 %vm1505_vm0, %v1504_v0 }
 0x1d5   : > { %v543_v13 = vpop.f32.mrb[0].mxu1  ;;  %v480_v18 = vpop.f32.mrb[0].mxu0 }
 0x1d6   : > { %v544_v14 = vadd.f32 %v543_v13, %v493_v11  ;;  %v1027_v15 = vpop.f32.mrb[1].mxu1  ;;  %v1019_v21 = vpop.f32.mrb[1].mxu0  ;;  %v481_v24 = vadd.f32 %v480_v18, %v429_v16 }
 0x1d7   : > { %v546_v17 = vpop.f32.mrb[2].mxu1  ;;  %v483_v22 = vpop.f32.mrb[2].mxu0 }
 0x1d8   : > { %v610_v19 = vpack.c.bf16 %v544_v14, %v544_v14  ;;  %v1028_v20 = vpop.f32.mrb[3].mxu1  ;;  %v1020_v25 = vpop.f32.mrb[3].mxu0  ;;  %v609_v26 = vpack.c.bf16 %v481_v24, %v481_v24 }
 0x1da   : > { %v615_v23 = vsel %vm442_vm1, %v610_v19, 0 }
 0x1db   : > { %1038 = vmatpush3.bf16.xpose.msra.mxu1 %v615_v23 }
 0x1dc   : > { %1049 = vmatprep.subr.bf16.mxu1 %v1504_v0 }
 0x1de   : > { %v603_v49 = vpop.f32.mrb[4].mxu0 }
 0x1df   : > { %v1035_v50 = vpop.f32.mrb[5].mxu0  ;;  %v604_v54 = vadd.f32 %v603_v49, %v556_v51 }
 0x1e0   : > { %v606_v52 = vpop.f32.mrb[6].mxu0 }
 0x1e1   : > { %v1036_v53 = vpop.f32.mrb[7].mxu0  ;;  %v679_v55 = vpack.c.bf16 %v604_v54, %v604_v54 }
 0x1e2   : > { %1040 = vmatmul.mubr.msk.bf16.vlgmr.msra.gmra.mrb[4].mxu1 %vm442_vm1, %v609_v26 }
 0x1e3   : > { %1053 = vmatprep.mubr.msk.bf16.mxu1 %vm1505_vm0, %v1504_v0  ;;  %v685_v56 = vsel %vm683_vm3, %v679_v55, 0  ;;  %1050 = vmatpush3.bf16.msra.mxu1 %v1185_v57 }
 0x1e4   : > { %1044 = vmatpush3.bf16.msra.mxu0 %v685_v56  ;;  %1051 = vmatprep.subr.bf16.mxu1 %v1504_v0  ;;  %v734_v0 = vsub.s32 3, %v1874_v8 }
 0x1e6   : > { %v735_v5 = vrot.slane %v1877_v10, %v734_v0 }
 0x1e7   : > { %1052 = vmatpush3.bf16.msra.mxu1 %v1186_v62 }
 0x2b5   : > { %v651_v29 = vpop.f32.mrb[4].mxu1 }
 0x2b6   : > { %v657_v30 = vmul.f32 0.5, %v651_v29  ;;  %1187 = vtanh.f32 %v651_v29  ;;  %v1041_v31 = vpop.f32.mrb[5].mxu1  ;;  %v663_v35 = vmax.f32 %v651_v29, 0.0 }
 0x2b7   : > { %v654_v32 = vpop.f32.mrb[6].mxu1 }
 0x2b8   : > { %1189 = vtanh.f32 %v657_v30  ;;  %v1042_v33 = vpop.f32.mrb[7].mxu1  ;;  %v664_v40 = vmul.f32 0.1, %v663_v35 }
 0x2c0   : > { %v1188_v34 = vpop.eup %1187 }
 0x2c1   : > { %v661_v38 = vmul.f32 0.15, %v1188_v34 }
 0x2c2   : > { %v1190_v36 = vpop.eup %1189 }
 0x2c3   : > { %v659_v37 = vmul.f32 0.1, %v1190_v36 }
 0x2c5   : > { %v662_v39 = vadd.f32 %v661_v38, %v659_v37 }
 0x2c7   : > { %v665_v41 = vadd.f32 %v664_v40, %v662_v39 }
 0x2c9   : > { %v667_v42 = vsel %vm666_vm2, %v665_v41, -inf }
 0x2ca   : > { %668 = vmax.xlane.f32.xlu0 %v667_v42 }
 0x357   : > { %v669_v43 = vpop.xlane.xlu0 %668 }
 0x358   : > { %v670_v44 = vsub.f32 %v665_v41, %v669_v43 }
 0x35a   : > { %v671_v45 = vmul.f32 1.442695, %v670_v44 }
 0x35c   : > { %1191 = vpow2.f32 %v671_v45 }
 0x366   : > { %v1192_v46 = vpop.eup %1191 }
 0x367   : > { %v673_v47 = vsel %vm666_vm2, %v1192_v46, 0.0 }
 0x368   : > { %674 = vadd.xlane.f32.xlu0 %v673_v47 }
 0x3f5   : > { %v675_v58 = vpop.xlane.xlu0 %674 }
 0x3f6   : > { %1193 = vrcp.f32 %v675_v58 }
 0x400   : > { %v1194_v59 = vpop.eup %1193 }
 0x401   : > { %v677_v60 = vmul.f32 %v1194_v59, %v1192_v46 }
 0x403   : > { %v678_v61 = vpack.c.bf16 %v677_v60, %v677_v60 }
 0x405   : > { %1046 = vmatmul.mubr.msk.bf16.vlgmr.msra.gmra.mrb[8].mxu0 %vm666_vm2, %v678_v61 }
 0x4d8   : > { %v721_v63 = vpop.f32.mrb[8].mxu0 }
 0x4d9   : > { %v727_v1 = vpack.c.bf16 %v721_v63, %v721_v63  ;;  %v1047_v2 = vpop.f32.mrb[9].mxu0 }
 0x4da   : > { %v724_v3 = vpop.f32.mrb[10].mxu0 }
 0x4db   : > { %v1048_v4 = vpop.f32.mrb[11].mxu0  ;;  %1054 = vmatmul.mubr.msk.bf16.vlgmr.msra.gmra.mrb[8].mxu1 %vm442_vm1, %v727_v1 }
 0x5ae   : > { %v785_v6 = vpop.f32.mrb[8].mxu1 }
 0x5af   : > { %v786_v7 = vadd.f32 %v785_v6, %v735_v5  ;;  %v1055_v9 = vpop.f32.mrb[9].mxu1 }
 0x5b0   : > { %v788_v8 = vpop.f32.mrb[10].mxu1 }
 0x5b1   : > { %v1056_v11 = vpop.f32.mrb[11].mxu1  ;;  %791 = vst.msk [vmem:[%s417_s5] sm:$0xff] %vm442_vm1, %v786_v7 }
 0x5b2   : > { %1408 = shalt.err (!%p1405_p6)
}
 0x5b3   : > { %s1409_s10 = scalar_lea.hbm %s1906_s6, 128  ;;  %s1413_s11 = scalar_lea.hbm %s1997_s2, 256 }
 0x5b4   : > { %p1410_p10 = scmp.ne.s32.totalorder %s1906_s6, %s1409_s10  ;;  %p1414_p8 = scmp.lt.u32.totalorder %s1906_s6, %s1997_s2 }
 0x5b5   : > { %p1415_p3 = scmp.lt.u32.totalorder %s1413_s11, %s1409_s10  ;;  %p1417_p13 = scmp.lt.u32.totalorder %s1409_s10, %s1906_s6 }
 0x5b6   : > { %p1411_p1 = pnand %p1410_p10, %p1998_p0 }
 0x5b7   : > { %p1416_p12 = por %p1415_p3, %p1414_p8 }
 0x5b8   : > { %p1412_p9 = pneg %p1411_p1 }
 0x5b9   : > { %p1418_p7 = por %p1417_p13, %p1416_p12 }
 0x5bb   : > { %p1419_p5 = pnand %p1418_p7, %p1412_p9 }
 0x5bd   : > { %1422 = shalt.err (!%p1419_p5)
}
 0x5be   : > { %1081 = dma.vmem_to_hbm [thread:$0]  (%p1998_p0), %s1908_s15, 128, %s1906_s6, %s793_s27  }
 0x5bf PF: > { %s819_s9 = sand.u32 1, %s1473_s24   ;;  %p1999_p2 = scmp.ne.s32.totalorder %s1987_s18, 0 }
 0x5c0   : > { %p2000_p4 = scmp.ge.s32.totalorder %s1493_s29, 2  ;;  %s820_s30 = scalar_lea.sflag [#allocation4], %s819_s9 }
 0x5c2   : > { %p1107_p11 = pnand %p2000_p4, %p1999_p2 }
 0x5c4   : > { %1468 = dma.done.wait (!%p1107_p11), %s820_s30, 128  }
 0x5c5   : > { %1470 = vsyncadd (!%p1107_p11), %s820_s30, 4294967168  ;;  %s28_s29 = sadd.s32 1, %s1493_s29   ;;  %s2001_s24 = smov %s1477_s25 }
 0x5c6   : > { %p25_p6 = scmp.ge.s32.totalorder %s28_s29, 4   ;;  %s2002_s25 = smov %s1481_s26 }
 0x5c7   : > { %s2003_s26 = smov %s1750_s16  ;;  %s2004_s27 = smov %s1489_s28 }
 0x5c8   : > { %s2005_s28 = smov %s2007_s17  ;;  %27 = sbr.rel (!%p25_p6) target bundleno = 17 (0x11), region = 126 }
 0x5cf   :  { %825 = vsyncpa [#allocation3], 1 }
 0x5d0   :  { %827 = vsyncpa [#allocation3 + $0x1], 1 }
 0x5d1   :  { %828 = vsyncpa [#allocation6], 1 }
 0x5d2   :  { %830 = vsyncpa [#allocation6 + $0x1], 1 }
 0x5d3   :  { %831 = vsyncpa [#allocation9], 1 }
 0x5d4   :  { %832 = vsyncpa [#allocation12], 1 }
 0x5d5   :  { %833 = vsyncpa [#allocation4], 1 }
 0x5d6   :  { %835 = vsyncpa [#allocation4 + $0x1], 1 }

</bundles_post_ra>
